<compile_context>
chip_gen: v6e
topology: v6e:2x2x1
jax: 0.10.0
libtpu: 0.0.40
codegen_flags: <defaults>
</compile_context>

<pallas_src>
import functools

import jax
import jax.numpy as jnp
from jax.experimental import pallas as pl
from jax.experimental.pallas import tpu as pltpu

MAX_LOG_STD = 2.0
MIN_LOG_STD = -20.0

# NT = contract the LAST dim of both operands (A @ B^T), done natively on MXU.
_NT_DIMS = (((1,), (1,)), ((), ()))


def _actor_kernel(obs_ref,
                  w1_ref, b1_ref,
                  w2_ref, b2_ref,
                  whead_ref, bhead_ref,
                  out_ref,
                  *, act_dim):
    """Forward for one batch tile, computed in transposed (feature, batch) space.

    obs_ref  : (TM, obs_dim)        -- natural row-major input layout
    w*_ref   : (out, in) weights, b*_ref: (out, 1) biases (PyTorch layout)
    out_ref  : (2*act_dim, TM)      -- rows [0, act_dim) = mu,
                                       rows [act_dim, 2*act_dim) = std
    """
    x = obs_ref[...]                                     # (TM, obs_dim)

    # hidden layer 1 + ReLU:  h1_t = relu(W1 @ x^T + b1)   -> (H1, TM)
    h = jax.lax.dot_general(w1_ref[...], x, _NT_DIMS,
                            preferred_element_type=jnp.float32) + b1_ref[...]
    h = jnp.maximum(h, 0.0)

    # hidden layer 2 + ReLU (create_mlp's output activation is also ReLU)
    h = jnp.dot(w2_ref[...], h,
                preferred_element_type=jnp.float32) + b2_ref[...]
    h = jnp.maximum(h, 0.0)

    # fused mu|log_std head: one matmul -> (2*act_dim, TM), fully lane-dense
    head = jnp.dot(whead_ref[...], h,
                   preferred_element_type=jnp.float32) + bhead_ref[...]

    # std rows: exp(clamp(log_std, MIN, MAX)); select per-sublane-row.
    # (exp on the mu rows is discarded by the where -- EUP is idle, so free.)
    std_all = jnp.exp(jnp.clip(head, MIN_LOG_STD, MAX_LOG_STD))
    row = jax.lax.broadcasted_iota(jnp.int32, head.shape, dimension=0)
    out_ref[...] = jnp.where(row >= act_dim, std_all, head)


def _round_up(x, m):
    return ((x + m - 1) // m) * m


def _reference_forward(obs, p):
    """Pure-JAX reference of the PyTorch forward (also the tiny-batch path)."""
    h = jnp.maximum(obs @ p["w1"].T + p["b1"].T, 0.0)
    h = jnp.maximum(h @ p["w2"].T + p["b2"].T, 0.0)
    mu = h @ p["wmu"].T + p["bmu"].T
    std = jnp.exp(jnp.clip(h @ p["wstd"].T + p["bstd"].T,
                           MIN_LOG_STD, MAX_LOG_STD))
    return mu, std


def continuous_actor_forward(obs, params, *,
                             max_block_rows=16384,
                             min_pallas_batch=512):
    """
    obs:    (B, obs_dim) float32
    params: dict with w1,b1,w2,b2,wmu,bmu,wstd,bstd; weights are PyTorch-layout
            (out_features, in_features), biases are (out_features, 1).
    returns (mu, std), each (B, act_dim) float32.
    """
    B, obs_dim = obs.shape
    act_dim = params["wmu"].shape[0]

    # Tiny batches: the pallas_call launch + DMA setup dwarfs the compute;
    # let XLA fuse the three tiny matmuls instead.
    if B <= min_pallas_batch:
        return _reference_forward(obs, params)

    # One-time layout plumbing: fuse the two heads (weights & biases).
    whead = jnp.concatenate([params["wmu"], params["wstd"]], axis=0)   # (2A, H)
    bhead = jnp.concatenate([params["bmu"], params["bstd"]], axis=0)   # (2A, 1)

    # Batch tiling (batch is the LANE dim of the output / intermediates).
    if B < 2048:
        # Single block covering the whole (un-padded) batch: block shape equals
        # the full array dims, so no (8,128) divisibility constraint applies.
        tm = B
    else:
        # >= 2 tiles so both v7x TensorCores get work ("parallel" grid axis);
        # lane-dim tiles must be a multiple of 128; cap for VMEM headroom.
        tm = min(_round_up(pl.cdiv(B, 2), 128), max_block_rows)
    grid = (pl.cdiv(B, tm),)   # ragged last tile handled by Pallas masking

    def resident(arr):
        # Weights/biases stay VMEM-resident across the whole grid.
        return pl.BlockSpec(arr.shape, lambda i: (0, 0))

    out_t = pl.pallas_call(
        functools.partial(_actor_kernel, act_dim=act_dim),
        out_shape=jax.ShapeDtypeStruct((2 * act_dim, B), jnp.float32),
        grid=grid,
        in_specs=[
            pl.BlockSpec((tm, obs_dim), lambda i: (i, 0)),
            resident(params["w1"]), resident(params["b1"]),
            resident(params["w2"]), resident(params["b2"]),
            resident(whead), resident(bhead),
        ],
        out_specs=pl.BlockSpec((2 * act_dim, tm), lambda i: (0, i)),
        compiler_params=pltpu.CompilerParams(
            dimension_semantics=("parallel",),
            vmem_limit_bytes=64 * 1024 * 1024),
    )(obs, params["w1"], params["b1"], params["w2"], params["b2"],
      whead, bhead)

    mu = out_t[:act_dim, :].T       # (B, act_dim) -- cheap small-slab copies
    std = out_t[act_dim:, :].T
    return mu, std


def init_params(key, obs_dim, act_dim, hidden_sizes):
    """Deterministic synthetic parameters in PyTorch layout: W (out,in), b (out,1)."""
    sizes = [obs_dim] + list(hidden_sizes)
    keys = jax.random.split(key, 8)

    def linear(kw, kb, fan_in, fan_out):
        scale = 1.0 / jnp.sqrt(jnp.float32(fan_in))
        w = jax.random.uniform(kw, (fan_out, fan_in), jnp.float32, -scale, scale)
        b = jax.random.uniform(kb, (fan_out, 1), jnp.float32, -scale, scale)
        return w, b

    w1, b1 = linear(keys[0], keys[1], sizes[0], sizes[1])
    w2, b2 = linear(keys[2], keys[3], sizes[1], sizes[2])
    wmu, bmu = linear(keys[4], keys[5], sizes[2], act_dim)
    wstd, bstd = linear(keys[6], keys[7], sizes[2], act_dim)
    return dict(w1=w1, b1=b1, w2=w2, b2=b2,
                wmu=wmu, bmu=bmu, wstd=wstd, bstd=bstd)


if __name__ == "__main__":
    obs_dim = 16
    act_dim = 4
    hidden_sizes = [32, 32]

    key = jax.random.PRNGKey(0)
    k_small, k_mid, k_big, k_params = jax.random.split(key, 4)
    params = init_params(k_params, obs_dim, act_dim, hidden_sizes)

    def check(obs, **kw):
        mu, std = continuous_actor_forward(obs, params, **kw)
        jax.block_until_ready((mu, std))
        mu_ref, std_ref = _reference_forward(obs, params)
        assert mu.shape == (obs.shape[0], act_dim)
        assert std.shape == (obs.shape[0], act_dim)
        assert jnp.allclose(mu, mu_ref, atol=1e-5, rtol=1e-5)
        assert jnp.allclose(std, std_ref, atol=1e-5, rtol=1e-5)
        assert bool(jnp.all(std > 0.0))

    # Case 1: tiny single-step batch, Pallas path forced (single full block,
    # block shape == array shape, no padding).
    obs_small = jax.random.normal(k_small, (8, obs_dim), dtype=jnp.float32)
    check(obs_small, min_pallas_batch=0)

    # Case 2: medium batch -> single full block (1000 rows, no pad, no ragged).
    obs_mid = jax.random.normal(k_mid, (1000, obs_dim), dtype=jnp.float32)
    check(obs_mid)

    # Case 3: larger batch -> 2 lane-dim tiles of 2560 (last one ragged),
    # exercising the multi-block "parallel" path with masked boundary block.
    obs_big = jax.random.normal(k_big, (5000, obs_dim), dtype=jnp.float32)
    check(obs_big)

    # TODO(synk): the PyTorch grad-clip register_hook is a backward-pass-only
    # feature and has no forward-pass (Pallas) equivalent.

    print("KERNEL_OK")
</pallas_src>

<mosaic_0001>
module attributes {stable_mosaic.version = 11 : i64} {
  func.func @_actor_kernel(%arg0: i32, %arg1: memref<8x16xf32, #tpu.memory_space<vmem>>, %arg2: memref<32x16xf32, #tpu.memory_space<vmem>>, %arg3: memref<32x1xf32, #tpu.memory_space<vmem>>, %arg4: memref<32x32xf32, #tpu.memory_space<vmem>>, %arg5: memref<32x1xf32, #tpu.memory_space<vmem>>, %arg6: memref<8x32xf32, #tpu.memory_space<vmem>>, %arg7: memref<8x1xf32, #tpu.memory_space<vmem>>, %arg8: memref<8x8xf32, #tpu.memory_space<vmem>>) attributes {dimension_semantics = [#tpu.dimension_semantics<parallel>], iteration_bounds = array<i64: 1>, scalar_prefetch = 0 : i64, scratch_operands = 0 : i64, tpu.core_type = #tpu.core_type<tc>, window_params = [{transform_indices = @transform_0, window_bounds = array<i64: 8, 16>}, {pipeline_mode = #tpu.pipeline_mode<synchronous>, transform_indices = @transform_1, window_bounds = array<i64: 32, 16>}, {pipeline_mode = #tpu.pipeline_mode<synchronous>, transform_indices = @transform_2, window_bounds = array<i64: 32, 1>}, {pipeline_mode = #tpu.pipeline_mode<synchronous>, transform_indices = @transform_3, window_bounds = array<i64: 32, 32>}, {pipeline_mode = #tpu.pipeline_mode<synchronous>, transform_indices = @transform_4, window_bounds = array<i64: 32, 1>}, {pipeline_mode = #tpu.pipeline_mode<synchronous>, transform_indices = @transform_5, window_bounds = array<i64: 8, 32>}, {pipeline_mode = #tpu.pipeline_mode<synchronous>, transform_indices = @transform_6, window_bounds = array<i64: 8, 1>}, {transform_indices = @transform_7, window_bounds = array<i64: 8, 8>}]} {
    %c0 = arith.constant 0 : index
    %c0_0 = arith.constant 0 : index
    %0 = vector.load %arg1[%c0, %c0_0] : memref<8x16xf32, #tpu.memory_space<vmem>>, vector<8x16xf32>
    %c0_1 = arith.constant 0 : index
    %c0_2 = arith.constant 0 : index
    %1 = vector.load %arg2[%c0_1, %c0_2] : memref<32x16xf32, #tpu.memory_space<vmem>>, vector<32x16xf32>
    %cst = arith.constant dense<0.000000e+00> : vector<32x8xf32>
    %2 = tpu.matmul %1, %0, %cst {dimension_numbers = #tpu.dot_dimension_numbers<[1], [1], [0], [0], [0, 0, 1, 0], [], []>} : vector<32x16xf32>, vector<8x16xf32>, vector<32x8xf32> -> vector<32x8xf32>
    %c0_3 = arith.constant 0 : index
    %c0_4 = arith.constant 0 : index
    %3 = vector.load %arg3[%c0_3, %c0_4] : memref<32x1xf32, #tpu.memory_space<vmem>>, vector<32x1xf32>
    %4 = vector.broadcast %3 : vector<32x1xf32> to vector<32x8xf32>
    %5 = arith.addf %2, %4 : vector<32x8xf32>
    %cst_5 = arith.constant 0.000000e+00 : f32
    %6 = vector.broadcast %cst_5 : f32 to vector<32x8xf32>
    %7 = arith.maximumf %5, %6 : vector<32x8xf32>
    %c0_6 = arith.constant 0 : index
    %c0_7 = arith.constant 0 : index
    %8 = vector.load %arg4[%c0_6, %c0_7] : memref<32x32xf32, #tpu.memory_space<vmem>>, vector<32x32xf32>
    %cst_8 = arith.constant dense<0.000000e+00> : vector<32x8xf32>
    %9 = tpu.matmul %8, %7, %cst_8 {dimension_numbers = #tpu.dot_dimension_numbers<[1], [0], [0], [1], [0, 0, 1, 1], [], []>} : vector<32x32xf32>, vector<32x8xf32>, vector<32x8xf32> -> vector<32x8xf32>
    %c0_9 = arith.constant 0 : index
    %c0_10 = arith.constant 0 : index
    %10 = vector.load %arg5[%c0_9, %c0_10] : memref<32x1xf32, #tpu.memory_space<vmem>>, vector<32x1xf32>
    %11 = vector.broadcast %10 : vector<32x1xf32> to vector<32x8xf32>
    %12 = arith.addf %9, %11 : vector<32x8xf32>
    %cst_11 = arith.constant 0.000000e+00 : f32
    %13 = vector.broadcast %cst_11 : f32 to vector<32x8xf32>
    %14 = arith.maximumf %12, %13 : vector<32x8xf32>
    %c0_12 = arith.constant 0 : index
    %c0_13 = arith.constant 0 : index
    %15 = vector.load %arg6[%c0_12, %c0_13] : memref<8x32xf32, #tpu.memory_space<vmem>>, vector<8x32xf32>
    %cst_14 = arith.constant dense<0.000000e+00> : vector<8x8xf32>
    %16 = tpu.matmul %15, %14, %cst_14 {dimension_numbers = #tpu.dot_dimension_numbers<[1], [0], [0], [1], [0, 0, 1, 1], [], []>} : vector<8x32xf32>, vector<32x8xf32>, vector<8x8xf32> -> vector<8x8xf32>
    %c0_15 = arith.constant 0 : index
    %c0_16 = arith.constant 0 : index
    %17 = vector.load %arg7[%c0_15, %c0_16] : memref<8x1xf32, #tpu.memory_space<vmem>>, vector<8x1xf32>
    %18 = vector.broadcast %17 : vector<8x1xf32> to vector<8x8xf32>
    %19 = arith.addf %16, %18 : vector<8x8xf32>
    %cst_17 = arith.constant -2.000000e+01 : f32
    %cst_18 = arith.constant 2.000000e+00 : f32
    %20 = vector.broadcast %cst_17 : f32 to vector<8x8xf32>
    %21 = arith.maximumf %20, %19 : vector<8x8xf32>
    %22 = vector.broadcast %cst_18 : f32 to vector<8x8xf32>
    %23 = arith.minimumf %22, %21 : vector<8x8xf32>
    %24 = math.exp %23 : vector<8x8xf32>
    %25 = tpu.iota {dimensions = array<i32: 0>} : vector<8x8xi32>
    %c4_i32 = arith.constant 4 : i32
    %26 = vector.broadcast %c4_i32 : i32 to vector<8x8xi32>
    %27 = arith.cmpi sge, %25, %26 : vector<8x8xi32>
    %28 = arith.select %27, %24, %19 : vector<8x8xi1>, vector<8x8xf32>
    %c0_19 = arith.constant 0 : index
    %c0_20 = arith.constant 0 : index
    %29 = vector.load %arg8[%c0_19, %c0_20] : memref<8x8xf32, #tpu.memory_space<vmem>>, vector<8x8xf32>
    tpu.vector_store %arg8[%c0_19, %c0_20], %28 {strides = array<i32>} : memref<8x8xf32, #tpu.memory_space<vmem>>, vector<8x8xf32>,
    return
  }
  func.func @transform_0(%arg0: i32) -> (i32, i32) {
    %c0_i32 = arith.constant 0 : i32
    %c0_i32_0 = arith.constant 0 : i32
    return %arg0, %c0_i32 : i32, i32
  }
  func.func @transform_1(%arg0: i32) -> (i32, i32) {
    %c0_i32 = arith.constant 0 : i32
    %c0_i32_0 = arith.constant 0 : i32
    %c0_i32_1 = arith.constant 0 : i32
    return %c0_i32, %c0_i32_0 : i32, i32
  }
  func.func @transform_2(%arg0: i32) -> (i32, i32) {
    %c0_i32 = arith.constant 0 : i32
    %c0_i32_0 = arith.constant 0 : i32
    %c0_i32_1 = arith.constant 0 : i32
    return %c0_i32, %c0_i32_0 : i32, i32
  }
  func.func @transform_3(%arg0: i32) -> (i32, i32) {
    %c0_i32 = arith.constant 0 : i32
    %c0_i32_0 = arith.constant 0 : i32
    %c0_i32_1 = arith.constant 0 : i32
    return %c0_i32, %c0_i32_0 : i32, i32
  }
  func.func @transform_4(%arg0: i32) -> (i32, i32) {
    %c0_i32 = arith.constant 0 : i32
    %c0_i32_0 = arith.constant 0 : i32
    %c0_i32_1 = arith.constant 0 : i32
    return %c0_i32, %c0_i32_0 : i32, i32
  }
  func.func @transform_5(%arg0: i32) -> (i32, i32) {
    %c0_i32 = arith.constant 0 : i32
    %c0_i32_0 = arith.constant 0 : i32
    %c0_i32_1 = arith.constant 0 : i32
    return %c0_i32, %c0_i32_0 : i32, i32
  }
  func.func @transform_6(%arg0: i32) -> (i32, i32) {
    %c0_i32 = arith.constant 0 : i32
    %c0_i32_0 = arith.constant 0 : i32
    %c0_i32_1 = arith.constant 0 : i32
    return %c0_i32, %c0_i32_0 : i32, i32
  }
  func.func @transform_7(%arg0: i32) -> (i32, i32) {
    %c0_i32 = arith.constant 0 : i32
    %c0_i32_0 = arith.constant 0 : i32
    return %c0_i32, %arg0 : i32, i32
  }
}

</mosaic_0001>

<bundles_post_ra>
// kernel: tpu_custom_call.1
= control target key start
LH: loop header
LB: loop body
LE: loop exit
PB: predicated region body
PF: predicated region fallthrough
CT: control target
= control target key end

     0   :  { %vm56_vm0 = vcmask 130048   ;;  %v486_v4 = vmov 0   ;;  %s601_s0 = inlined_call_operand.vmem [shape: f32[8,16], index: 0, kind: input, shape index: {}]   ;;  %s602_s1 = inlined_call_operand.vmem [shape: f32[32,16], index: 1, kind: input, shape index: {}]   ;;  %s603_s2 = inlined_call_operand.vmem [shape: f32[32,1], index: 2, kind: input, shape index: {}]   ;;  %s604_s3 = inlined_call_operand.vmem [shape: f32[32,32], index: 3, kind: input, shape index: {}]   ;;  %s605_s4 = inlined_call_operand.vmem [shape: f32[32,1], index: 4, kind: input, shape index: {}]   ;;  %s606_s5 = inlined_call_operand.vmem [shape: f32[8,32], index: 5, kind: input, shape index: {}]   ;;  %s607_s6 = inlined_call_operand.vmem [shape: f32[8,1], index: 6, kind: input, shape index: {}]   ;;  %s608_s7 = inlined_call_operand.hbm [shape: f32[8,8], index: 7, kind: output, shape index: {}]  }
   0x1   :  { %v27_v0 = vld [vmem:[%s601_s0] sm:$0xff]  ;;  %v35_v2 = vld [vmem:[%s603_s2 + $0x18] sm:$0xff]  ;;  %v29_v3 = vld [vmem:[%s602_s1 + $0x8] sm:$0xff]  ;;  %460 = vset.pattern.permute.xlu0 %v486_v4  ;;  %461 = vset.pattern.permute.xlu1 %v486_v4 }
   0x2   :  { %v28_v1 = vld [vmem:[%s602_s1] sm:$0xff]  ;;  %423 = vmatprep.subr.msk.mxu0 %vm56_vm0, %v27_v0  ;;  %v33_v5 = vld [vmem:[%s603_s2 + $0x8] sm:$0xff]  ;;  %v30_v6 = vld [vmem:[%s602_s1 + $0x10] sm:$0xff]  ;;  %53 = vperm.xlu0 %460, %v35_v2  }
   0x3   :  { %425 = vmatprep.mubr.msk.f32.mxu0 %vm56_vm0, %v28_v1  ;;  %424 = vmatpush3.xpose.msk.msra.mxu0 %vm56_vm0, %v27_v0  ;;  %v34_v7 = vld [vmem:[%s603_s2 + $0x10] sm:$0xff] }
   0x4   :  { %43 = vperm.xlu1 %461, %v33_v5  }
   0x5   :  { %12 = vsyncpa [#allocation3], 0  ;;  %v32_v8 = vld [vmem:[%s603_s2] sm:$0xff]  ;;  %v31_v9 = vld [vmem:[%s602_s1 + $0x18] sm:$0xff]  ;;  %vm189_vm1 = vcmask 261120   ;;  %v487_v35 = vmov 0.0   ;;  %v375_v60 = vlaneseq }
   0x6   :  { %426 = vmatmul.mubr.msk.f32.vlgmr.msra.gmra.mxu0 %vm56_vm0, %v29_v3  ;;  %48 = vperm.xlu0 %460, %v34_v7   ;;  %v168_v10 = vld [vmem:[%s605_s4 + $0x18] sm:$0xff]  ;;  %v167_v11 = vld [vmem:[%s605_s4 + $0x10] sm:$0xff]  ;;  %v166_v12 = vld [vmem:[%s605_s4 + $0x8] sm:$0xff]  ;;  %vm488_vm2 = vmmov 0   ;;  %s489_s9 = smov [#allocation2]   ;;  %vm379_vm4 = vcmask 64512  }
   0x7   :  { %428 = vmatprep.mubr.msk.f32.mxu0 %vm56_vm0, %v30_v6  ;;  %v165_v13 = vld [vmem:[%s605_s4] sm:$0xff]  ;;  %v162_v32 = vld [vmem:[%s604_s3 + $0x8] sm:$0xff]  ;;  %v163_v33 = vld [vmem:[%s604_s3 + $0x10] sm:$0xff]  ;;  %445 = vmatprep.subr.mxu0 %v487_v35  ;;  %v376_v61 = vshrl.u32 %v375_v60, 7  ;;  %s387_s10 = sshll.u32 %s489_s9, 4  ;;  %s388_s10 = int_to_ptr.vmem [resolvable:$true] %s387_s10 }
   0x8   :  { %38 = vperm.xlu1 %461, %v32_v8   ;;  %v292_v14 = vld [vmem:[%s607_s6] sm:$0xff]  ;;  %v164_v34 = vld [vmem:[%s604_s3 + $0x18] sm:$0xff]  ;;  %p469_p1 = scmp.lt.s32.totalorder %s388_s10, %s388_s10 }
   0x9   :  { %v161_v15 = vld [vmem:[%s604_s3] sm:$0xff]  ;;  %vm377_vm3 = vcmp.ge.s32.totalorder %v376_v61, 4 }
   0xa   :  { %429 = vmatmul.mubr.msk.f32.gmra.mxu0 %vm56_vm0, %v31_v9  ;;  %186 = vperm.xlu0 %460, %v168_v10   ;;  %v291_v52 = vld [vmem:[%s606_s5] sm:$0xff]  ;;  %s464_s5 = scalar_lea.vmem %s388_s10, 128 }
   0xb   :  { %439 = vmatprep.mubr.msk.f32.mxu1 %vm189_vm1, %v161_v15  ;;  %453 = vmatprep.mubr.msk.f32.mxu0 %vm488_vm2, %v487_v35  ;;  %p465_p0 = scmp.ne.s32.totalorder %s388_s10, %s464_s5  ;;  %p470_p2 = scmp.lt.s32.totalorder %s464_s5, %s464_s5 }
   0xc   :  { %181 = vperm.xlu1 %461, %v167_v11  }
   0xd   :  { %p471_p3 = por %p470_p2, %p469_p1 }
   0xe   :  { %176 = vperm.xlu0 %460, %v166_v12  }
   0xf   :  { %p472_p4 = pnand %p471_p3, %p465_p0 }
  0x10   :  { %171 = vperm.xlu1 %461, %v165_v13  }
  0x12   :  { %295 = vperm.xlu0 %460, %v292_v14  }
  0x7d   :  { %v54_v16 = vpop.permute.xlu0 %53 }
  0x7f   :  { %v44_v18 = vpop.permute.xlu1 %43 }
  0x81   :  { %v49_v22 = vpop.permute.xlu0 %48 }
  0x83   :  { %v39_v27 = vpop.permute.xlu1 %38 }
  0x85   :  { %v187_v36 = vpop.permute.xlu0 %186 }
  0x87   :  { %v182_v38 = vpop.permute.xlu1 %181 }
  0x89   :  { %v177_v42 = vpop.permute.xlu0 %176 }
  0x8b   :  { %v172_v47 = vpop.permute.xlu1 %171 }
  0x8d   :  { %v296_v53 = vpop.permute.xlu0 %295 }
  0xc6   :  { %v427_v17 = vpop.f32.mrf.mxu0 }
  0xc7   :  { %v144_v24 = vadd.f32 %v427_v17, %v44_v18 }
  0xc8   :  { %v138_v19 = vpop.f32.mrf.mxu0 }
  0xc9   :  { %v139_v28 = vadd.f32 %v138_v19, %v39_v27  ;;  %v158_v30 = vmax.f32 %v144_v24, 0.0 }
  0xca   :  { %v430_v20 = vpop.f32.mrf.mxu0 }
  0xcb   :  { %v154_v21 = vadd.f32 %v430_v20, %v54_v16  ;;  %v157_v31 = vmax.f32 %v139_v28, 0.0 }
  0xcc   :  { %v148_v23 = vpop.f32.mrf.mxu0 }
  0xcd   :  { %v160_v25 = vmax.f32 %v154_v21, 0.0  ;;  %v149_v26 = vadd.f32 %v148_v23, %v49_v22 }
  0xcf   :  { %v159_v29 = vmax.f32 %v149_v26, 0.0  ;;  %431 = vmatprep.subr.mxu1 %v160_v25 }
  0xd0   :  { %432 = vmatpush3.msra.mxu1 %v160_v25 }
  0xd1   :  { %433 = vmatprep.subr.mxu1 %v159_v29 }
  0xd2   :  { %434 = vmatpush3.msra.mxu1 %v159_v29 }
  0xd3   :  { %435 = vmatprep.subr.mxu1 %v158_v30 }
  0xd4   :  { %436 = vmatpush3.msra.mxu1 %v158_v30 }
  0xd5   :  { %437 = vmatprep.subr.mxu1 %v157_v31 }
  0xd6   :  { %438 = vmatpush3.msra.mxu1 %v157_v31 }
  0xd7   :  { %440 = vmatmul.mubr.msk.f32.vlgmr.msra.gmra.mxu1 %vm189_vm1, %v162_v32 }
  0xd8   :  { %442 = vmatprep.mubr.msk.f32.mxu1 %vm189_vm1, %v163_v33 }
  0xdb   :  { %443 = vmatmul.mubr.msk.f32.gmra.mxu1 %vm189_vm1, %v164_v34 }
 0x197   :  { %v441_v37 = vpop.f32.mrf.mxu1 }
 0x198   :  { %v274_v44 = vadd.f32 %v441_v37, %v177_v42 }
 0x199   :  { %v268_v39 = vpop.f32.mrf.mxu1 }
 0x19a   :  { %v269_v48 = vadd.f32 %v268_v39, %v172_v47  ;;  %v288_v50 = vmax.f32 %v274_v44, 0.0 }
 0x19b   :  { %v444_v40 = vpop.f32.mrf.mxu1 }
 0x19c   :  { %v284_v41 = vadd.f32 %v444_v40, %v187_v36  ;;  %v287_v51 = vmax.f32 %v269_v48, 0.0 }
 0x19d   :  { %v278_v43 = vpop.f32.mrf.mxu1 }
 0x19e   :  { %v290_v45 = vmax.f32 %v284_v41, 0.0  ;;  %v279_v46 = vadd.f32 %v278_v43, %v182_v38 }
 0x1a0   :  { %v289_v49 = vmax.f32 %v279_v46, 0.0  ;;  %446 = vmatpush3.msra.mxu0 %v290_v45 }
 0x1a1   :  { %447 = vmatprep.subr.mxu0 %v487_v35 }
 0x1a2   :  { %448 = vmatpush3.msra.mxu0 %v289_v49 }
 0x1a3   :  { %449 = vmatprep.subr.mxu0 %v487_v35 }
 0x1a4   :  { %450 = vmatpush3.msra.mxu0 %v288_v50 }
 0x1a5   :  { %451 = vmatprep.subr.mxu0 %v487_v35 }
 0x1a6   :  { %452 = vmatpush3.msra.mxu0 %v287_v51 }
 0x1a7   :  { %454 = vmatmul.mubr.msk.f32.vlgmr.msra.gmra.mxu0 %vm189_vm1, %v291_v52 }
 0x267   :  { %v367_v54 = vpop.f32.mrf.mxu0 }
 0x268   :  { %v368_v55 = vadd.f32 %v367_v54, %v296_v53 }
 0x269   :  { %v455_v56 = vpop.f32.mrf.mxu0 }
 0x26a   :  { %v371_v57 = vmax.f32 %v368_v55, -20.0 }
 0x26c   :  { %v372_v58 = vmin.f32 %v371_v57, 2.0 }
 0x26e   :  { %v373_v59 = vmul.f32 1.442695, %v372_v58 }
 0x270   :  { %462 = vpow2.f32 %v373_v59 }
 0x27d   :  { %v463_v62 = vpop.eup %462 }
 0x27e   :  { %v378_v63 = vsel %vm377_vm3, %v463_v62, %v368_v55 }
 0x27f   :  { %380 = vst.msk [vmem:[#allocation2] sm:$0xff] %vm379_vm4, %v378_v63 }
 0x280   :  { %475 = shalt.err (!%p472_p4)
}
 0x281   :  { %390 = dma.vmem_to_hbm [thread:$0]  %s388_s10, 128, %s608_s7, [#allocation3]  }
 0x282   :  { %484 = dma.done.wait [#allocation3], 128  }
 0x283   :  { %485 = vsyncadd [#allocation3], 4294967168 }
 0x284   :  { %394 = vsyncpa [#allocation3], 1 }

</bundles_post_ra>
